<compile_context>
chip_gen: v6e
topology: v6e:2x2x1
jax: 0.10.0
libtpu: 0.0.40
codegen_flags: <defaults>
</compile_context>

<pallas_src>
import jax
import jax.numpy as jnp
import numpy as np
from jax.experimental import pallas as pl
from jax.experimental.pallas import tpu as pltpu

HIDDEN = 32
HEADS = 4
HEAD_DIM = HIDDEN // HEADS
B = 2
S = 8


def mha_kernel(x_ref, bias_ref, wqkv_ref, bqkv_ref, wout_ref, bout_ref, out_ref):
    # x_ref:    (B*S, HIDDEN)          batch folded into the row dim
    # bias_ref: (B*S, B*S)             additive mask (block-diag batch + key mask)
    # wqkv_ref: (HIDDEN, 3*HIDDEN)     column-permuted so output is [Q | K | V]
    # bqkv_ref: (1, 3*HIDDEN)
    # wout_ref: (HIDDEN, HIDDEN)       pre-transposed fc_out weight
    # bout_ref: (1, HIDDEN)
    x = x_ref[...]

    # Single QKV projection for the whole batch (one MXU matmul).
    qkv = jnp.dot(x, wqkv_ref[...], preferred_element_type=jnp.float32) + bqkv_ref[...]

    q2 = qkv[:, :HIDDEN]                 # (B*S, HIDDEN), heads are contiguous hd-wide blocks
    k2 = qkv[:, HIDDEN:2 * HIDDEN]
    v2 = qkv[:, 2 * HIDDEN:]

    # Stack heads along the (cheap) leading dim -> (HEADS, B*S, hd)
    q3 = jnp.stack([q2[:, h * HEAD_DIM:(h + 1) * HEAD_DIM] for h in range(HEADS)], axis=0)
    k3 = jnp.stack([k2[:, h * HEAD_DIM:(h + 1) * HEAD_DIM] for h in range(HEADS)], axis=0)
    v3 = jnp.stack([v2[:, h * HEAD_DIM:(h + 1) * HEAD_DIM] for h in range(HEADS)], axis=0)

    scale = 1.0 / (HEAD_DIM ** 0.5)
    # Batched scores over heads: (HEADS, B*S, B*S)
    scores = jnp.einsum('hqd,hkd->hqk', q3, k3, preferred_element_type=jnp.float32) * scale
    # Additive mask bias (broadcast over heads). Finite -1e30: exp underflows to
    # exactly 0 for masked / cross-batch keys, no NaN path.
    scores = scores + bias_ref[...]

    # Numerically-stable batched softmax along keys.
    m = jnp.max(scores, axis=-1, keepdims=True)
    e = jnp.exp(scores - m)
    denom = jnp.sum(e, axis=-1, keepdims=True)
    w = e * pl.reciprocal(denom, approx=True)        # divide moved to EUP slot

    # Batched attention @ V: (HEADS, B*S, hd)
    ctx = jnp.einsum('hqk,hkd->hqd', w, v3, preferred_element_type=jnp.float32)

    # Fold the head concat into the output projection:
    #   out = sum_h ctx[h] @ W_out^T[h*hd:(h+1)*hd, :]
    wout = wout_ref[...]
    acc = jnp.dot(ctx[0], wout[:HEAD_DIM, :], preferred_element_type=jnp.float32)
    for h in range(1, HEADS):
        acc = acc + jnp.dot(ctx[h], wout[h * HEAD_DIM:(h + 1) * HEAD_DIM, :],
                            preferred_element_type=jnp.float32)

    out_ref[...] = (acc + bout_ref[...]).astype(out_ref.dtype)


def mha_forward(x, attention_mask, wqkv_t, bqkv, wout_t, bout):
    Bn, Sn, H = x.shape

    # (1) Fold batch into the row dimension -> single kernel invocation, no grid.
    x2 = x.reshape(Bn * Sn, H)

    # (2) One-time weight-column permutation so the projection output is
    #     [Q(all heads) | K(all heads) | V(all heads)], matching PyTorch's
    #     view(B,S,heads,3*hd).chunk(3) selection exactly.
    cols = np.arange(3 * H).reshape(HEADS, 3, HEAD_DIM)   # [head, chunk, dim] -> original column
    perm = cols.transpose(1, 0, 2).reshape(-1)            # chunk-major ordering
    wqkv_p = wqkv_t[:, perm]
    bqkv_p = bqkv[:, perm]

    # (3) Precomputed additive bias: block-diagonal over batches (so folded
    #     batches never attend to each other) AND the key padding mask.
    batch_ids = jnp.repeat(jnp.arange(Bn), Sn)                      # (B*S,)
    same_batch = batch_ids[:, None] == batch_ids[None, :]           # (B*S, B*S)
    key_ok = (attention_mask.reshape(Bn * Sn) != 0)[None, :]        # (1, B*S)
    bias = jnp.where(same_batch & key_ok, 0.0, -1e30).astype(jnp.float32)

    out2 = pl.pallas_call(
        mha_kernel,
        out_shape=jax.ShapeDtypeStruct((Bn * Sn, H), x.dtype),
        in_specs=[pl.BlockSpec(memory_space=pltpu.MemorySpace.VMEM)] * 6,
        out_specs=pl.BlockSpec(memory_space=pltpu.MemorySpace.VMEM),
    )(x2, bias, wqkv_p, bqkv_p, wout_t, bout)

    return out2.reshape(Bn, Sn, H)


def reference_forward(x, attention_mask, wqkv_t, bqkv, wout_t, bout):
    """Pure-JAX replica of the PyTorch forward (for verification)."""
    Bn, Sn, H = x.shape
    qkv = x @ wqkv_t + bqkv[0]                                  # (B, S, 3H)
    qkv = qkv.reshape(Bn, Sn, HEADS, 3 * HEAD_DIM)
    q, k, v = jnp.split(qkv, 3, axis=-1)
    q, k, v = [t.transpose(0, 2, 1, 3) for t in (q, k, v)]      # (B, heads, S, hd)
    scores = jnp.einsum('bhqd,bhkd->bhqk', q, k) / (HEAD_DIM ** 0.5)
    m = attention_mask[:, None, None, :]                        # (B,1,1,S)
    scores = jnp.where(m == 0, -jnp.inf, scores)
    w = jax.nn.softmax(scores, axis=-1)
    out = jnp.einsum('bhqk,bhkd->bhqd', w, v)
    out = out.transpose(0, 2, 1, 3).reshape(Bn, Sn, H)
    return out @ wout_t + bout[0]


if __name__ == "__main__":
    key = jax.random.PRNGKey(0)
    kx, kw1, kb1, kw2, kb2 = jax.random.split(key, 5)

    x = jax.random.normal(kx, (B, S, HIDDEN), dtype=jnp.float32)

    # Parameters (deterministic init; nn.Linear shapes, stored pre-transposed).
    wqkv_t = jax.random.normal(kw1, (HIDDEN, 3 * HIDDEN), dtype=jnp.float32) * 0.05
    bqkv = jax.random.normal(kb1, (1, 3 * HIDDEN), dtype=jnp.float32) * 0.05
    wout_t = jax.random.normal(kw2, (HIDDEN, HIDDEN), dtype=jnp.float32) * 0.05
    bout = jax.random.normal(kb2, (1, HIDDEN), dtype=jnp.float32) * 0.05

    # attention_mask: 1 = attend, 0 = masked (per key position), shape (B, S)
    # (mirrors the torch module's attention_mask[:, None, None, :] usage)
    attention_mask = jnp.ones((B, S), dtype=jnp.float32)
    attention_mask = attention_mask.at[1, S - 1].set(0.0)
    attention_mask = attention_mask.at[1, S - 2].set(0.0)

    out = mha_forward(x, attention_mask, wqkv_t, bqkv, wout_t, bout)
    out = jax.block_until_ready(out)

    ref = reference_forward(x, attention_mask, wqkv_t, bqkv, wout_t, bout)
    # Tolerance relaxed slightly because the softmax normalization uses the
    # approximate EUP reciprocal (pl.reciprocal(..., approx=True)).
    np.testing.assert_allclose(np.asarray(out), np.asarray(ref), rtol=2e-3, atol=2e-3)

    print("KERNEL_OK")
</pallas_src>

<mosaic_0001>
module attributes {stable_mosaic.version = 11 : i64} {
  func.func @mha_kernel(%arg0: memref<16x32xf32, #tpu.memory_space<vmem>>, %arg1: memref<16x16xf32, #tpu.memory_space<vmem>>, %arg2: memref<32x96xf32, #tpu.memory_space<vmem>>, %arg3: memref<1x96xf32, #tpu.memory_space<vmem>>, %arg4: memref<32x32xf32, #tpu.memory_space<vmem>>, %arg5: memref<1x32xf32, #tpu.memory_space<vmem>>, %arg6: memref<16x32xf32, #tpu.memory_space<vmem>>) attributes {dimension_semantics = [], scalar_prefetch = 0 : i64, scratch_operands = 0 : i64, tpu.core_type = #tpu.core_type<tc>} {
    %c0 = arith.constant 0 : index
    %c0_0 = arith.constant 0 : index
    %0 = vector.load %arg0[%c0, %c0_0] : memref<16x32xf32, #tpu.memory_space<vmem>>, vector<16x32xf32>
    %c0_1 = arith.constant 0 : index
    %c0_2 = arith.constant 0 : index
    %1 = vector.load %arg2[%c0_1, %c0_2] : memref<32x96xf32, #tpu.memory_space<vmem>>, vector<32x96xf32>
    %cst = arith.constant dense<0.000000e+00> : vector<16x96xf32>
    %2 = tpu.matmul %0, %1, %cst {dimension_numbers = #tpu.dot_dimension_numbers<[1], [0], [0], [1], [0, 0, 1, 1], [], []>} : vector<16x32xf32>, vector<32x96xf32>, vector<16x96xf32> -> vector<16x96xf32>
    %c0_3 = arith.constant 0 : index
    %c0_4 = arith.constant 0 : index
    %3 = vector.load %arg3[%c0_3, %c0_4] : memref<1x96xf32, #tpu.memory_space<vmem>>, vector<1x96xf32>
    %4 = vector.broadcast %3 : vector<1x96xf32> to vector<16x96xf32>
    %5 = arith.addf %2, %4 : vector<16x96xf32>
    %6 = vector.extract_strided_slice %5 {offsets = [0, 0], sizes = [16, 32], strides = [1, 1]} : vector<16x96xf32> to vector<16x32xf32>
    %7 = vector.extract_strided_slice %5 {offsets = [0, 32], sizes = [16, 32], strides = [1, 1]} : vector<16x96xf32> to vector<16x32xf32>
    %8 = vector.extract_strided_slice %5 {offsets = [0, 64], sizes = [16, 32], strides = [1, 1]} : vector<16x96xf32> to vector<16x32xf32>
    %9 = vector.extract_strided_slice %6 {offsets = [0, 0], sizes = [16, 8], strides = [1, 1]} : vector<16x32xf32> to vector<16x8xf32>
    %10 = vector.extract_strided_slice %6 {offsets = [0, 8], sizes = [16, 8], strides = [1, 1]} : vector<16x32xf32> to vector<16x8xf32>
    %11 = vector.extract_strided_slice %6 {offsets = [0, 16], sizes = [16, 8], strides = [1, 1]} : vector<16x32xf32> to vector<16x8xf32>
    %12 = vector.extract_strided_slice %6 {offsets = [0, 24], sizes = [16, 8], strides = [1, 1]} : vector<16x32xf32> to vector<16x8xf32>
    %13 = vector.shape_cast %9 : vector<16x8xf32> to vector<1x16x8xf32>
    %14 = vector.shape_cast %10 : vector<16x8xf32> to vector<1x16x8xf32>
    %15 = vector.shape_cast %11 : vector<16x8xf32> to vector<1x16x8xf32>
    %16 = vector.shape_cast %12 : vector<16x8xf32> to vector<1x16x8xf32>
    %17 = tpu.concatenate %13, %14, %15, %16 in 0 : vector<1x16x8xf32>, vector<1x16x8xf32>, vector<1x16x8xf32>, vector<1x16x8xf32> -> vector<4x16x8xf32>
    %18 = vector.extract_strided_slice %7 {offsets = [0, 0], sizes = [16, 8], strides = [1, 1]} : vector<16x32xf32> to vector<16x8xf32>
    %19 = vector.extract_strided_slice %7 {offsets = [0, 8], sizes = [16, 8], strides = [1, 1]} : vector<16x32xf32> to vector<16x8xf32>
    %20 = vector.extract_strided_slice %7 {offsets = [0, 16], sizes = [16, 8], strides = [1, 1]} : vector<16x32xf32> to vector<16x8xf32>
    %21 = vector.extract_strided_slice %7 {offsets = [0, 24], sizes = [16, 8], strides = [1, 1]} : vector<16x32xf32> to vector<16x8xf32>
    %22 = vector.shape_cast %18 : vector<16x8xf32> to vector<1x16x8xf32>
    %23 = vector.shape_cast %19 : vector<16x8xf32> to vector<1x16x8xf32>
    %24 = vector.shape_cast %20 : vector<16x8xf32> to vector<1x16x8xf32>
    %25 = vector.shape_cast %21 : vector<16x8xf32> to vector<1x16x8xf32>
    %26 = tpu.concatenate %22, %23, %24, %25 in 0 : vector<1x16x8xf32>, vector<1x16x8xf32>, vector<1x16x8xf32>, vector<1x16x8xf32> -> vector<4x16x8xf32>
    %27 = vector.extract_strided_slice %8 {offsets = [0, 0], sizes = [16, 8], strides = [1, 1]} : vector<16x32xf32> to vector<16x8xf32>
    %28 = vector.extract_strided_slice %8 {offsets = [0, 8], sizes = [16, 8], strides = [1, 1]} : vector<16x32xf32> to vector<16x8xf32>
    %29 = vector.extract_strided_slice %8 {offsets = [0, 16], sizes = [16, 8], strides = [1, 1]} : vector<16x32xf32> to vector<16x8xf32>
    %30 = vector.extract_strided_slice %8 {offsets = [0, 24], sizes = [16, 8], strides = [1, 1]} : vector<16x32xf32> to vector<16x8xf32>
    %31 = vector.shape_cast %27 : vector<16x8xf32> to vector<1x16x8xf32>
    %32 = vector.shape_cast %28 : vector<16x8xf32> to vector<1x16x8xf32>
    %33 = vector.shape_cast %29 : vector<16x8xf32> to vector<1x16x8xf32>
    %34 = vector.shape_cast %30 : vector<16x8xf32> to vector<1x16x8xf32>
    %35 = tpu.concatenate %31, %32, %33, %34 in 0 : vector<1x16x8xf32>, vector<1x16x8xf32>, vector<1x16x8xf32>, vector<1x16x8xf32> -> vector<4x16x8xf32>
    "tpu.trace_start"() <{level = 10 : i32, message = "hqd,hkd->hqk"}> : () -> ()
    %cst_5 = arith.constant dense<0.000000e+00> : vector<4x16x16xf32>
    %36 = tpu.matmul %17, %26, %cst_5 {dimension_numbers = #tpu.dot_dimension_numbers<[2], [2], [1], [1], [0, 0, 0, 1, 1, 1], [0], [0]>} : vector<4x16x8xf32>, vector<4x16x8xf32>, vector<4x16x16xf32> -> vector<4x16x16xf32>
    "tpu.trace_stop"() : () -> ()
    %cst_6 = arith.constant 0.353553385 : f32
    %37 = vector.broadcast %cst_6 : f32 to vector<4x16x16xf32>
    %38 = arith.mulf %36, %37 : vector<4x16x16xf32>
    %c0_7 = arith.constant 0 : index
    %c0_8 = arith.constant 0 : index
    %39 = vector.load %arg1[%c0_7, %c0_8] : memref<16x16xf32, #tpu.memory_space<vmem>>, vector<16x16xf32>
    %40 = vector.shape_cast %39 : vector<16x16xf32> to vector<1x16x16xf32>
    %41 = vector.broadcast %40 : vector<1x16x16xf32> to vector<4x16x16xf32>
    %42 = arith.addf %38, %41 : vector<4x16x16xf32>
    %cst_9 = arith.constant dense<0xFF800000> : vector<4x16xf32>
    %43 = vector.multi_reduction <maximumf>, %42, %cst_9 [2] : vector<4x16x16xf32> to vector<4x16xf32>
    %44 = vector.shape_cast %43 : vector<4x16xf32> to vector<4x16x1xf32>
    %45 = vector.broadcast %44 : vector<4x16x1xf32> to vector<4x16x16xf32>
    %46 = arith.subf %42, %45 : vector<4x16x16xf32>
    %47 = math.exp %46 : vector<4x16x16xf32>
    %cst_10 = arith.constant dense<0.000000e+00> : vector<4x16xf32>
    %48 = vector.multi_reduction <add>, %47, %cst_10 [2] : vector<4x16x16xf32> to vector<4x16xf32>
    %49 = vector.shape_cast %48 : vector<4x16xf32> to vector<4x16x1xf32>
    %50 = tpu.reciprocal %49 {approx = true} : vector<4x16x1xf32> -> vector<4x16x1xf32>
    %51 = vector.broadcast %50 : vector<4x16x1xf32> to vector<4x16x16xf32>
    %52 = arith.mulf %47, %51 : vector<4x16x16xf32>
    "tpu.trace_start"() <{level = 10 : i32, message = "hqk,hkd->hqd"}> : () -> ()
    %cst_11 = arith.constant dense<0.000000e+00> : vector<4x16x8xf32>
    %53 = tpu.matmul %52, %35, %cst_11 {dimension_numbers = #tpu.dot_dimension_numbers<[2], [1], [1], [2], [0, 0, 0, 1, 1, 2], [0], [0]>} : vector<4x16x16xf32>, vector<4x16x8xf32>, vector<4x16x8xf32> -> vector<4x16x8xf32>
    "tpu.trace_stop"() : () -> ()
    %c0_12 = arith.constant 0 : index
    %c0_13 = arith.constant 0 : index
    %54 = vector.load %arg4[%c0_12, %c0_13] : memref<32x32xf32, #tpu.memory_space<vmem>>, vector<32x32xf32>
    %55 = vector.extract_strided_slice %53 {offsets = [0, 0, 0], sizes = [1, 16, 8], strides = [1, 1, 1]} : vector<4x16x8xf32> to vector<1x16x8xf32>
    %56 = vector.shape_cast %55 : vector<1x16x8xf32> to vector<16x8xf32>
    %57 = vector.extract_strided_slice %54 {offsets = [0, 0], sizes = [8, 32], strides = [1, 1]} : vector<32x32xf32> to vector<8x32xf32>
    %cst_14 = arith.constant dense<0.000000e+00> : vector<16x32xf32>
    %58 = tpu.matmul %56, %57, %cst_14 {dimension_numbers = #tpu.dot_dimension_numbers<[1], [0], [0], [1], [0, 0, 1, 1], [], []>} : vector<16x8xf32>, vector<8x32xf32>, vector<16x32xf32> -> vector<16x32xf32>
    %59 = vector.extract_strided_slice %53 {offsets = [1, 0, 0], sizes = [1, 16, 8], strides = [1, 1, 1]} : vector<4x16x8xf32> to vector<1x16x8xf32>
    %60 = vector.shape_cast %59 : vector<1x16x8xf32> to vector<16x8xf32>
    %61 = vector.extract_strided_slice %54 {offsets = [8, 0], sizes = [8, 32], strides = [1, 1]} : vector<32x32xf32> to vector<8x32xf32>
    %cst_15 = arith.constant dense<0.000000e+00> : vector<16x32xf32>
    %62 = tpu.matmul %60, %61, %cst_15 {dimension_numbers = #tpu.dot_dimension_numbers<[1], [0], [0], [1], [0, 0, 1, 1], [], []>} : vector<16x8xf32>, vector<8x32xf32>, vector<16x32xf32> -> vector<16x32xf32>
    %63 = arith.addf %58, %62 : vector<16x32xf32>
    %64 = vector.extract_strided_slice %53 {offsets = [2, 0, 0], sizes = [1, 16, 8], strides = [1, 1, 1]} : vector<4x16x8xf32> to vector<1x16x8xf32>
    %65 = vector.shape_cast %64 : vector<1x16x8xf32> to vector<16x8xf32>
    %66 = vector.extract_strided_slice %54 {offsets = [16, 0], sizes = [8, 32], strides = [1, 1]} : vector<32x32xf32> to vector<8x32xf32>
    %cst_16 = arith.constant dense<0.000000e+00> : vector<16x32xf32>
    %67 = tpu.matmul %65, %66, %cst_16 {dimension_numbers = #tpu.dot_dimension_numbers<[1], [0], [0], [1], [0, 0, 1, 1], [], []>} : vector<16x8xf32>, vector<8x32xf32>, vector<16x32xf32> -> vector<16x32xf32>
    %68 = arith.addf %63, %67 : vector<16x32xf32>
    %69 = vector.extract_strided_slice %53 {offsets = [3, 0, 0], sizes = [1, 16, 8], strides = [1, 1, 1]} : vector<4x16x8xf32> to vector<1x16x8xf32>
    %70 = vector.shape_cast %69 : vector<1x16x8xf32> to vector<16x8xf32>
    %71 = vector.extract_strided_slice %54 {offsets = [24, 0], sizes = [8, 32], strides = [1, 1]} : vector<32x32xf32> to vector<8x32xf32>
    %cst_17 = arith.constant dense<0.000000e+00> : vector<16x32xf32>
    %72 = tpu.matmul %70, %71, %cst_17 {dimension_numbers = #tpu.dot_dimension_numbers<[1], [0], [0], [1], [0, 0, 1, 1], [], []>} : vector<16x8xf32>, vector<8x32xf32>, vector<16x32xf32> -> vector<16x32xf32>
    %73 = arith.addf %68, %72 : vector<16x32xf32>
    %c0_18 = arith.constant 0 : index
    %c0_19 = arith.constant 0 : index
    %74 = vector.load %arg5[%c0_18, %c0_19] : memref<1x32xf32, #tpu.memory_space<vmem>>, vector<1x32xf32>
    %75 = vector.broadcast %74 : vector<1x32xf32> to vector<16x32xf32>
    %76 = arith.addf %73, %75 : vector<16x32xf32>
    %c0_20 = arith.constant 0 : index
    %c0_21 = arith.constant 0 : index
    %77 = vector.load %arg6[%c0_20, %c0_21] : memref<16x32xf32, #tpu.memory_space<vmem>>, vector<16x32xf32>
    tpu.vector_store %arg6[%c0_20, %c0_21], %76 {strides = array<i32>} : memref<16x32xf32, #tpu.memory_space<vmem>>, vector<16x32xf32>,
    return
  }
}

</mosaic_0001>

<bundles_post_ra>
// kernel: tpu_custom_call.1
= control target key start
LH: loop header
LB: loop body
LE: loop exit
PB: predicated region body
PF: predicated region fallthrough
CT: control target
= control target key end

     0   :  { %11 = vsyncpa [#allocation3], 0  ;;  %s1884_s0 = inlined_call_operand.hbm [shape: f32[16,32], index: 0, kind: input, shape index: {}]   ;;  %s1885_s1 = inlined_call_operand.hbm [shape: f32[16,16], index: 1, kind: input, shape index: {}]   ;;  %s1886_s2 = inlined_call_operand.hbm [shape: f32[32,96], index: 2, kind: input, shape index: {}]   ;;  %s1887_s3 = inlined_call_operand.vmem [shape: f32[1,96], index: 3, kind: input, shape index: {}]   ;;  %s1888_s4 = inlined_call_operand.hbm [shape: f32[32,32], index: 4, kind: input, shape index: {}]   ;;  %s1889_s5 = inlined_call_operand.vmem [shape: f32[1,32], index: 5, kind: input, shape index: {}]   ;;  %s1890_s6 = inlined_call_operand.hbm [shape: f32[16,32], index: 6, kind: output, shape index: {}]  }
   0x1   :  { %12 = vsyncpa [#allocation6], 0 }
   0x2   :  { %13 = vsyncpa [#allocation9], 0 }
   0x3   :  { %14 = vsyncpa [#allocation4], 0  ;;  %s1679_s21 = smov [#allocation5]   ;;  %s1680_s23 = smov [#allocation2]  }
   0x4   :  { %s32_s22 = sshll.u32 %s1679_s21, 4  ;;  %s20_s24 = sshll.u32 %s1680_s23, 4  ;;  %s33_s22 = int_to_ptr.vmem [resolvable:$true] %s32_s22  ;;  %s21_s24 = int_to_ptr.vmem [resolvable:$true] %s20_s24 }
   0x5   :  { %s1579_s25 = scalar_lea.vmem %s33_s22, 256  ;;  %p1584_p1 = scmp.lt.s32.totalorder %s33_s22, %s33_s22 }
   0x6   :  { %p1580_p0 = scmp.ne.s32.totalorder %s33_s22, %s1579_s25  ;;  %p1585_p2 = scmp.lt.s32.totalorder %s1579_s25, %s1579_s25 }
   0x8   :  { %p1586_p3 = por %p1585_p2, %p1584_p1 }
   0xa   :  { %p1587_p4 = pnand %p1586_p3, %p1580_p0 }
   0xc   :  { %1590 = shalt.err (!%p1587_p4)
}
   0xd   :  { %s1681_s26 = smov 128   ;;  %s1682_s27 = smov 8  }
   0xe   :  { %38 = dma.hbm_to_vmem [thread:$0]  %s1885_s1, 256, %s33_s22, [#allocation6], %s1681_s26, %s1681_s26, %s1682_s27  }
   0xf   :  { %s1599_s30 = scalar_lea.vmem %s21_s24, 256  ;;  %p1604_p6 = scmp.lt.s32.totalorder %s21_s24, %s21_s24 }
  0x10   :  { %p1600_p5 = scmp.ne.s32.totalorder %s21_s24, %s1599_s30  ;;  %p1605_p7 = scmp.lt.s32.totalorder %s1599_s30, %s1599_s30 }
  0x12   :  { %p1606_p8 = por %p1605_p7, %p1604_p6 }
  0x14   :  { %p1607_p9 = pnand %p1606_p8, %p1600_p5 }
  0x16   :  { %1610 = shalt.err (!%p1607_p9)
}
  0x17   :  { %26 = dma.hbm_to_vmem [thread:$0]  %s1884_s0, 256, %s21_s24, [#allocation3], %s1681_s26, %s1681_s26, %s1682_s27  }
  0x18   :  { %s1683_s9 = smov [#allocation7]   ;;  %s1684_s11 = smov [#allocation8]  }
  0x19   :  { %s44_s10 = sshll.u32 %s1683_s9, 4  ;;  %s58_s12 = sshll.u32 %s1684_s11, 4  ;;  %s45_s10 = int_to_ptr.vmem [resolvable:$true] %s44_s10  ;;  %s59_s12 = int_to_ptr.vmem [resolvable:$true] %s58_s12 }
  0x1a   :  { %s1619_s1 = scalar_lea.vmem %s45_s10, 512  ;;  %p1624_p11 = scmp.lt.s32.totalorder %s45_s10, %s45_s10 }
  0x1b   :  { %p1620_p10 = scmp.ne.s32.totalorder %s45_s10, %s1619_s1  ;;  %p1625_p12 = scmp.lt.s32.totalorder %s1619_s1, %s1619_s1 }
  0x1d   :  { %p1626_p13 = por %p1625_p12, %p1624_p11 }
  0x1f   :  { %p1627_p0 = pnand %p1626_p13, %p1620_p10 }
  0x21   :  { %1630 = shalt.err (!%p1627_p0)
}
  0x22   :  { %50 = dma.hbm_to_vmem [thread:$0]  %s1886_s2, 512, %s45_s10, [#allocation6], %s1681_s26, %s1681_s26, %s1682_s27  }
  0x23   :  { %s1639_s0 = scalar_lea.vmem %s59_s12, 512  ;;  %p1644_p2 = scmp.lt.s32.totalorder %s59_s12, %s59_s12 }
  0x24   :  { %p1640_p1 = scmp.ne.s32.totalorder %s59_s12, %s1639_s0  ;;  %p1645_p3 = scmp.lt.s32.totalorder %s1639_s0, %s1639_s0 }
  0x26   :  { %p1646_p4 = por %p1645_p3, %p1644_p2 }
  0x28   :  { %p1647_p5 = pnand %p1646_p4, %p1640_p1 }
  0x2a   :  { %1650 = shalt.err (!%p1647_p5)
}
  0x2b   :  { %64 = dma.hbm_to_vmem [thread:$0]  %s1888_s4, 512, %s59_s12, [#allocation9], %s1681_s26, %s1681_s26, %s1682_s27  }
  0x2c   :  { %1671 = dma.done.wait [#allocation3], 256  }
  0x2d   :  { %1672 = vsyncadd [#allocation3], 4294967040 }
  0x2e   :  { %1673 = dma.done.wait [#allocation6], 768  }
  0x2f   :  { %1674 = vsyncadd [#allocation6], 4294966528 }
  0x30   :  { %1675 = dma.done.wait [#allocation9], 512  }
  0x31   :  { %1676 = vsyncadd [#allocation9], 4294966784  ;;  %vm92_vm0 = vcmask 261120   ;;  %v84_v0 = vld [vmem:[#allocation7 + $0x18] sm:$0xff]  ;;  %v83_v1 = vld [vmem:[#allocation7 + $0x10] sm:$0xff]  ;;  %vm192_vm1 = vcmask 64512  }
  0x32   :  { %1440 = vmatprep.subr.mxu0 %v84_v0  ;;  %v79_v2 = vld [vmem:[#allocation2] sm:$0xff]  ;;  %v82_v3 = vld [vmem:[#allocation7 + $0x8] sm:$0xff]  ;;  %s1685_s17 = smov 112   ;;  %s1686_s18 = smov 120   ;;  %v546_v26 = vld [vmem:[#allocation5 + $0x8] sm:$0xff]  ;;  %vm555_vm2 = vcmask 130048  }
  0x33   :  { %1441 = vmatpush3.msra.mxu0 %v84_v0  ;;  %1448 = vmatprep.mubr.msk.f32.mxu0 %vm92_vm0, %v79_v2  ;;  %v81_v4 = vld [vmem:[#allocation7] sm:$0xff]  ;;  %v80_v5 = vld [vmem:[#allocation2 + $0x8] sm:$0xff]  ;;  %s1687_s19 = smov 104   ;;  %v545_v29 = vld [vmem:[#allocation5] sm:$0xff]  ;;  %s1689_s20 = smov 64  }
  0x34   :  { %1442 = vmatprep.subr.mxu0 %v83_v1  ;;  %v1354_v6 = vld [vmem:[%s1887_s3] ss:$0 sm:$0xff]  ;;  %s1688_s3 = smov 96   ;;  %s1690_s23 = smov [#allocation10]  }
  0x35   :  { %1443 = vmatpush3.msra.mxu0 %v83_v1  ;;  %s1340_s24 = sshll.u32 %s1690_s23, 4  ;;  %s1341_s24 = int_to_ptr.vmem [resolvable:$true] %s1340_s24 }
  0x36   :  { %1444 = vmatprep.subr.mxu0 %v82_v3  ;;  %s1651_s25 = scalar_lea.vmem %s1341_s24, 256  ;;  %p1656_p7 = scmp.lt.s32.totalorder %s1341_s24, %s1341_s24 }
  0x37   :  { %1445 = vmatpush3.msra.mxu0 %v82_v3  ;;  %p1652_p6 = scmp.ne.s32.totalorder %s1341_s24, %s1651_s25  ;;  %p1657_p8 = scmp.lt.s32.totalorder %s1651_s25, %s1651_s25 }
  0x38   :  { %1446 = vmatprep.subr.mxu0 %v81_v4 }
  0x39   :  { %1447 = vmatpush3.msra.mxu0 %v81_v4  ;;  %p1658_p9 = por %p1657_p8, %p1656_p7 }
  0x3a   :  { %1449 = vmatmul.mubr.msk.f32.vlgmr.msra.gmra.mxu0 %vm92_vm0, %v80_v5 }
  0x3b   :  { %p1659_p10 = pnand %p1658_p9, %p1652_p6 }
  0xfa   :  { %v1450_v7 = vpop.f32.mrf.mxu0 }
  0xfb   :  { %v1755_v8 = vadd.f32 %v1450_v7, %v1354_v6 }
  0xfc   :  { %v165_v9 = vpop.f32.mrf.mxu0 }
  0xfd   :  { %v1757_v10 = vadd.f32 %v1354_v6, %v165_v9  ;;  %182 = vrot.lane.b32.xlu1 %v1755_v8, %s1685_s17  ;;  %178 = vrot.lane.b32.xlu0 %v1755_v8, %s1686_s18 }
  0xff   :  { %1455 = vmatprep.mubr.msk.f32.mxu1 %vm192_vm1, %v1757_v10 }
 0x101   :  { %186 = vrot.lane.b32.xlu1 %v1755_v8, %s1687_s19  ;;  %176 = vrot.lane.b32.xlu0 %v1757_v10, %s1686_s18 }
 0x105   :  { %184 = vrot.lane.b32.xlu1 %v1757_v10, %s1687_s19  ;;  %180 = vrot.lane.b32.xlu0 %v1757_v10, %s1685_s17 }
 0x109   :  { %190 = vrot.lane.b32.xlu0 %v1755_v8, %s1688_s3 }
 0x10d   :  { %188 = vrot.lane.b32.xlu0 %v1757_v10, %s1688_s3 }
 0x16f   :  { %v1769_v11 = vpop.permute.xlu1 %182  ;;  %v1771_v12 = vpop.permute.xlu0 %178 }
 0x170   :  { %278 = vrot.lane.b32.xlu1 %v1771_v12, %s1688_s3  ;;  %365 = vrot.lane.b32.xlu0 %v1769_v11, %s1688_s3 }
 0x173   :  { %v1775_v13 = vpop.permute.xlu0 %176  ;;  %v1780_v14 = vpop.permute.xlu1 %186 }
 0x174   :  { %1462 = vmatprep.mubr.msk.f32.mxu0 %vm192_vm1, %v1775_v13  ;;  %276 = vrot.lane.b32.xlu1 %v1775_v13, %s1688_s3 }
 0x177   :  { %v1782_v15 = vpop.permute.xlu0 %180  ;;  %v1786_v16 = vpop.permute.xlu1 %184 }
 0x178   :  { %452 = vrot.lane.b32.xlu1 %v1780_v14, %s1688_s3  ;;  %363 = vrot.lane.b32.xlu0 %v1782_v15, %s1688_s3 }
 0x17b   :  { %v191_v17 = vpop.permute.xlu0 %190 }
 0x17c   :  { %450 = vrot.lane.b32.xlu1 %v1786_v16, %s1688_s3  ;;  %1451 = vmatprep.subr.msk.mxu1 %vm192_vm1, %v191_v17 }
 0x17d   :  { %1452 = vmatpush3.xpose.msk.msra.mxu1 %vm192_vm1, %v191_v17 }
 0x17f   :  { %v189_v18 = vpop.permute.xlu0 %188 }
 0x180   :  { %1453 = vmatprep.subr.msk.mxu1 %vm192_vm1, %v189_v18 }
 0x181   :  { %1454 = vmatpush3.xpose.msk.msra.mxu1 %vm192_vm1, %v189_v18 }
 0x184   :  { %1456 = vmatmul.mubr.msk.f32.vlgmr.msra.gmra.mxu1 %vm192_vm1, %v1755_v8 }
 0x185   :  { %1469 = vmatprep.mubr.msk.f32.mxu1 %vm192_vm1, %v1782_v15 }
 0x1e2   :  { %v279_v19 = vpop.permute.xlu1 %278  ;;  %v366_v20 = vpop.permute.xlu0 %365 }
 0x1e3   :  { %1458 = vmatprep.subr.msk.mxu0 %vm192_vm1, %v279_v19  ;;  %1465 = vmatprep.subr.msk.mxu1 %vm192_vm1, %v366_v20 }
 0x1e4   :  { %1459 = vmatpush3.xpose.msk.msra.mxu0 %vm192_vm1, %v279_v19  ;;  %1466 = vmatpush3.xpose.msk.msra.mxu1 %vm192_vm1, %v366_v20 }
 0x1e6   :  { %v277_v21 = vpop.permute.xlu1 %276 }
 0x1e7   :  { %1460 = vmatprep.subr.msk.mxu0 %vm192_vm1, %v277_v21 }
 0x1e8   :  { %1461 = vmatpush3.xpose.msk.msra.mxu0 %vm192_vm1, %v277_v21 }
 0x1ea   :  { %v453_v22 = vpop.permute.xlu1 %452  ;;  %v364_v23 = vpop.permute.xlu0 %363 }
 0x1eb   :  { %1463 = vmatmul.mubr.msk.f32.vlgmr.msra.gmra.mxu0 %vm192_vm1, %v1771_v12  ;;  %1467 = vmatprep.subr.msk.mxu1 %vm192_vm1, %v364_v23 }
 0x1ec   :  { %1472 = vmatprep.subr.msk.mxu0 %vm192_vm1, %v453_v22  ;;  %1468 = vmatpush3.xpose.msk.msra.mxu1 %vm192_vm1, %v364_v23 }
 0x1ed   :  { %1473 = vmatpush3.xpose.msk.msra.mxu0 %vm192_vm1, %v453_v22  ;;  %1476 = vmatprep.mubr.msk.f32.mxu0 %vm192_vm1, %v1786_v16 }
 0x1ee   :  { %v451_v24 = vpop.permute.xlu1 %450 }
 0x1ef   :  { %1470 = vmatmul.mubr.msk.f32.vlgmr.msra.gmra.mxu1 %vm192_vm1, %v1769_v11  ;;  %1474 = vmatprep.subr.msk.mxu0 %vm192_vm1, %v451_v24 }
 0x1f1   :  { %1475 = vmatpush3.xpose.msk.msra.mxu0 %vm192_vm1, %v451_v24 }
 0x1f4   :  { %1477 = vmatmul.mubr.msk.f32.vlgmr.msra.gmra.mxu0 %vm192_vm1, %v1780_v14 }
 0x244   :  { %v1457_v25 = vpop.f32.mrf.mxu1 }
 0x245   :  { %v538_v27 = vmul.f32 0.35355338, %v1457_v25 }
 0x246   :  { %v267_v28 = vpop.f32.mrf.mxu1 }
 0x247   :  { %v537_v30 = vmul.f32 0.35355338, %v267_v28  ;;  %v548_v31 = vadd.f32 %v546_v26, %v538_v27 }
 0x249   :  { %v559_v32 = vsel %vm555_vm2, %v548_v31, -inf  ;;  %v547_v33 = vadd.f32 %v545_v29, %v537_v30 }
 0x24a   :  { %560 = vmax.xlane.f32.xlu1 %v559_v32 }
 0x24b   :  { %v556_v34 = vsel %vm555_vm2, %v547_v33, -inf }
 0x24c   :  { %557 = vmax.xlane.f32.xlu0 %v556_v34 }
 0x2ab   :  { %v1464_v35 = vpop.f32.mrf.mxu0 }
 0x2ac   :  { %v540_v36 = vmul.f32 0.35355338, %v1464_v35 }
 0x2ad   :  { %v354_v37 = vpop.f32.mrf.mxu0 }
 0x2ae   :  { %v539_v38 = vmul.f32 0.35355338, %v354_v37  ;;  %v550_v39 = vadd.f32 %v546_v26, %v540_v36 }
 0x2af   :  { %v1471_v40 = vpop.f32.mrf.mxu1 }
 0x2b0   :  { %v542_v41 = vmul.f32 0.35355338, %v1471_v40  ;;  %v565_v42 = vsel %vm555_vm2, %v550_v39, -inf  ;;  %v549_v43 = vadd.f32 %v545_v29, %v539_v38 }
 0x2b1   :  { %566 = vmax.xlane.f32.xlu0 %v565_v42  ;;  %v441_v44 = vpop.f32.mrf.mxu1 }
 0x2b2   :  { %v541_v45 = vmul.f32 0.35355338, %v441_v44  ;;  %v562_v47 = vsel %vm555_vm2, %v549_v43, -inf  ;;  %v552_v49 = vadd.f32 %v546_v26, %v542_v41 }
 0x2b4   :  { %v1478_v46 = vpop.f32.mrf.mxu0  ;;  %v551_v48 = vadd.f32 %v545_v29, %v541_v45  ;;  %v571_v54 = vsel %vm555_vm2, %v552_v49, -inf }
 0x2b5   :  { %v544_v50 = vmul.f32 0.35355338, %v1478_v46  ;;  %563 = vmax.xlane.f32.xlu0 %v562_v47 }
 0x2b6   :  { %v528_v51 = vpop.f32.mrf.mxu0  ;;  %v568_v52 = vsel %vm555_vm2, %v551_v48, -inf }
 0x2b7   :  { %v543_v53 = vmul.f32 0.35355338, %v528_v51  ;;  %569 = vmax.xlane.f32.xlu1 %v568_v52  ;;  %v554_v55 = vadd.f32 %v546_v26, %v544_v50 }
 0x2b9   :  { %572 = vmax.xlane.f32.xlu0 %v571_v54  ;;  %v553_v56 = vadd.f32 %v545_v29, %v543_v53  ;;  %v577_v58 = vsel %vm555_vm2, %v554_v55, -inf }
 0x2bb   :  { %v574_v57 = vsel %vm555_vm2, %v553_v56, -inf }
 0x2bc   :  { %575 = vmax.xlane.f32.xlu1 %v574_v57 }
 0x2bd   :  { %578 = vmax.xlane.f32.xlu0 %v577_v58 }
 0x2cd   :  { %646 = vrot.lane.b32.xlu1 %v1755_v8, %s1689_s20 }
 0x2d1   :  { %733 = vrot.lane.b32.xlu1 %v1771_v12, %s1689_s20 }
 0x2d3   :  { %644 = vrot.lane.b32.xlu0 %v1757_v10, %s1689_s20  ;;  %v561_v59 = vpop.xlane.xlu1 %560 }
 0x2d4   :  { %v581_v60 = vsub.f32 %v548_v31, %v561_v59 }
 0x2d5   :  { %731 = vrot.lane.b32.xlu1 %v1775_v13, %s1689_s20  ;;  %v558_v62 = vpop.xlane.xlu0 %557 }
 0x2d6   :  { %v590_v61 = vmul.f32 1.442695, %v581_v60  ;;  %v580_v63 = vsub.f32 %v547_v33, %v558_v62  ;;  %v992_v62 = vld [vmem:[#allocation8] sm:$0xff] }
 0x2d7   :  { %820 = vrot.lane.b32.xlu0 %v1769_v11, %s1689_s20 }
 0x2d8   :  { %1539 = vpow2.f32 %v590_v61  ;;  %v588_v0 = vmul.f32 1.442695, %v580_v63 }
 0x2d9   :  { %818 = vrot.lane.b32.xlu1 %v1782_v15, %s1689_s20 }
 0x2da   :  { %1541 = vpow2.f32 %v588_v0 }
 0x2e5   :  { %v1837_v1 = vpop.eup %1539 }
 0x2e6   :  { %v607_v2 = vsel %vm555_vm2, %v1837_v1, 0.0 }
 0x2e7   :  { %v1841_v3 = vpop.eup %1541 }
 0x2e8   :  { %v604_v4 = vsel %vm555_vm2, %v1841_v3, 0.0 }
 0x2f6   :  { %608 = vadd.xlane.f32.xlu0 %v607_v2 }
 0x2fd   :  { %605 = vadd.xlane.f32.xlu1 %v604_v4  ;;  %v993_v4 = vld [vmem:[#allocation8 + $0x8] sm:$0xff] }
 0x33a   :  { %v567_v5 = vpop.xlane.xlu0 %566 }
 0x33b   :  { %v583_v6 = vsub.f32 %v550_v39, %v567_v5  ;;  %v994_v5 = vld [vmem:[#allocation8 + $0x10] sm:$0xff] }
 0x33d   :  { %v594_v7 = vmul.f32 1.442695, %v583_v6  ;;  %v995_v6 = vld [vmem:[#allocation8 + $0x18] sm:$0xff] }
 0x33e   :  { %v564_v8 = vpop.xlane.xlu0 %563 }
 0x33f   :  { %1543 = vpow2.f32 %v594_v7  ;;  %v582_v9 = vsub.f32 %v549_v43, %v564_v8 }
 0x340   :  { %v570_v10 = vpop.xlane.xlu1 %569 }
 0x341   :  { %v592_v11 = vmul.f32 1.442695, %v582_v9  ;;  %v584_v12 = vsub.f32 %v551_v48, %v570_v10 }
 0x342   :  { %v573_v13 = vpop.xlane.xlu0 %572 }
 0x343   :  { %1545 = vpow2.f32 %v592_v11  ;;  %v596_v15 = vmul.f32 1.442695, %v584_v12  ;;  %v585_v17 = vsub.f32 %v552_v49, %v573_v13 }
 0x345   :  { %v598_v18 = vmul.f32 1.442695, %v585_v17  ;;  %v576_v19 = vpop.xlane.xlu1 %575  ;;  %1547 = vpow2.f32 %v596_v15 }
 0x346   :  { %v586_v20 = vsub.f32 %v553_v56, %v576_v19  ;;  %v579_v21 = vpop.xlane.xlu0 %578 }
 0x347   :  { %1549 = vpow2.f32 %v598_v18  ;;  %v587_v22 = vsub.f32 %v554_v55, %v579_v21 }
 0x348   :  { %v600_v23 = vmul.f32 1.442695, %v586_v20 }
 0x349   :  { %v602_v24 = vmul.f32 1.442695, %v587_v22  ;;  %v647_v25 = vpop.permute.xlu1 %646 }
 0x34a   :  { %1551 = vpow2.f32 %v600_v23  ;;  %1479 = vmatprep.subr.mxu1 %v647_v25  ;;  %v645_v26 = vpop.permute.xlu0 %644 }
 0x34b   :  { %1553 = vpow2.f32 %v602_v24  ;;  %1480 = vmatpush3.msra.mxu1 %v647_v25 }
 0x34c   :  { %v1544_v27 = vpop.eup %1543  ;;  %1481 = vmatprep.subr.mxu1 %v645_v26 }
 0x34d   :  { %1482 = vmatpush3.msra.mxu1 %v645_v26  ;;  %v734_v28 = vpop.permute.xlu1 %733  ;;  %v613_v29 = vsel %vm555_vm2, %v1544_v27, 0.0 }
 0x34e   :  { %1486 = vmatprep.subr.mxu1 %v734_v28  ;;  %614 = vadd.xlane.f32.xlu0 %v613_v29  ;;  %v821_v30 = vpop.permute.xlu0 %820 }
 0x34f   :  { %1493 = vmatprep.subr.mxu0 %v821_v30 }
 0x350   :  { %v1546_v31 = vpop.eup %1545  ;;  %1494 = vmatpush3.msra.mxu0 %v821_v30 }
 0x351   :  { %v732_v32 = vpop.permute.xlu1 %731  ;;  %v610_v33 = vsel %vm555_vm2, %v1546_v31, 0.0 }
 0x352   :  { %611 = vadd.xlane.f32.xlu1 %v610_v33  ;;  %v1548_v34 = vpop.eup %1547 }
 0x353   :  { %v616_v38 = vsel %vm555_vm2, %v1548_v34, 0.0 }
 0x354   :  { %v1550_v35 = vpop.eup %1549 }
 0x355   :  { %v819_v36 = vpop.permute.xlu1 %818  ;;  %v619_v37 = vsel %vm555_vm2, %v1550_v35, 0.0 }
 0x356   :  { %1495 = vmatprep.subr.mxu0 %v819_v36  ;;  %620 = vadd.xlane.f32.xlu0 %v619_v37 }
 0x357   :  { %v1552_v39 = vpop.eup %1551  ;;  %617 = vadd.xlane.f32.xlu1 %v616_v38  ;;  %1496 = vmatpush3.msra.mxu0 %v819_v36 }
 0x358   :  { %v1554_v40 = vpop.eup %1553  ;;  %v622_v42 = vsel %vm555_vm2, %v1552_v39, 0.0  ;;  %1507 = vmatprep.subr.mxu0 %v993_v4 }
 0x359   :  { %v625_v41 = vsel %vm555_vm2, %v1554_v40, 0.0 }
 0x35a   :  { %626 = vadd.xlane.f32.xlu0 %v625_v41 }
 0x35b   :  { %623 = vadd.xlane.f32.xlu1 %v622_v42 }
 0x36c   :  { %905 = vrot.lane.b32.xlu1 %v1786_v16, %s1689_s20 }
 0x370   :  { %907 = vrot.lane.b32.xlu0 %v1780_v14, %s1689_s20 }
 0x37f   :  { %v609_v43 = vpop.xlane.xlu0 %608 }
 0x380   :  { %1555 = vrcp.f32 %v609_v43 }
 0x386   :  { %v606_v44 = vpop.xlane.xlu1 %605 }
 0x387   :  { %1557 = vrcp.f32 %v606_v44 }
 0x38d   :  { %v1556_v45 = vpop.eup %1555 }
 0x38e   :  { %v637_v48 = vmul.f32 %v1556_v45, %v1837_v1 }
 0x394   :  { %v1558_v46 = vpop.eup %1557 }
 0x395   :  { %v636_v47 = vmul.f32 %v1558_v46, %v1841_v3 }
 0x397   :  { %1483 = vmatprep.mubr.msk.f32.mxu1 %vm555_vm2, %v636_v47 }
 0x398   :  { %1484 = vmatmul.mubr.msk.f32.vlgmr.msra.gmra.mxu1 %vm555_vm2, %v637_v48 }
 0x399   :  { %1487 = vmatpush3.msra.mxu1 %v734_v28 }
 0x39a   :  { %1488 = vmatprep.subr.mxu1 %v732_v32 }
 0x39b   :  { %1489 = vmatpush3.msra.mxu1 %v732_v32 }
 0x3d7   :  { %v615_v16 = vpop.xlane.xlu0 %614 }
 0x3d8   :  { %1559 = vrcp.f32 %v615_v16 }
 0x3db   :  { %v612_v14 = vpop.xlane.xlu1 %611 }
 0x3dc   :  { %1561 = vrcp.f32 %v612_v14 }
 0x3df   :  { %v621_v49 = vpop.xlane.xlu0 %620 }
 0x3e0   :  { %1563 = vrcp.f32 %v621_v49  ;;  %v618_v50 = vpop.xlane.xlu1 %617 }
 0x3e1   :  { %1565 = vrcp.f32 %v618_v50 }
 0x3e3   :  { %v627_v51 = vpop.xlane.xlu0 %626 }
 0x3e4   :  { %1567 = vrcp.f32 %v627_v51  ;;  %v624_v52 = vpop.xlane.xlu1 %623 }
 0x3e5   :  { %1569 = vrcp.f32 %v624_v52  ;;  %v1560_v54 = vpop.eup %1559 }
 0x3e6   :  { %v639_v57 = vmul.f32 %v1560_v54, %v1544_v27  ;;  %v1389_v27 = vld [vmem:[%s1889_s5] ss:$0 sm:$0xff] }
 0x3e7   :  { %v908_v53 = vpop.permute.xlu0 %907 }
 0x3e8   :  { %1500 = vmatprep.subr.mxu1 %v908_v53  ;;  %v906_v60 = vpop.permute.xlu1 %905 }
 0x3e9   :  { %v1562_v55 = vpop.eup %1561 }
 0x3ea   :  { %v638_v56 = vmul.f32 %v1562_v55, %v1546_v31 }
 0x3ec   :  { %1490 = vmatprep.mubr.msk.f32.mxu1 %vm555_vm2, %v638_v56 }
 0x3ed   :  { %v1564_v58 = vpop.eup %1563  ;;  %1491 = vmatmul.mubr.msk.f32.vlgmr.msra.gmra.mxu1 %vm555_vm2, %v639_v57 }
 0x3ee   :  { %v1566_v59 = vpop.eup %1565  ;;  %1501 = vmatpush3.msra.mxu1 %v908_v53  ;;  %v641_v61 = vmul.f32 %v1564_v58, %v1550_v35 }
 0x3ef   :  { %1502 = vmatprep.subr.mxu1 %v906_v60  ;;  %v640_v63 = vmul.f32 %v1566_v59, %v1548_v34 }
 0x3f0   :  { %1503 = vmatpush3.msra.mxu1 %v906_v60 }
 0x3f1   :  { %v1568_v0 = vpop.eup %1567  ;;  %1497 = vmatprep.mubr.msk.f32.mxu0 %vm555_vm2, %v640_v63  ;;  %1512 = vmatprep.subr.mxu1 %v992_v62 }
 0x3f2   :  { %v1570_v1 = vpop.eup %1569  ;;  %1498 = vmatmul.mubr.msk.f32.vlgmr.msra.gmra.mxu0 %vm555_vm2, %v641_v61  ;;  %v643_v2 = vmul.f32 %v1568_v0, %v1554_v40 }
 0x3f3   :  { %v642_v3 = vmul.f32 %v1570_v1, %v1552_v39  ;;  %1508 = vmatpush3.msra.mxu0 %v993_v4 }
 0x3f4   :  { %1517 = vmatprep.subr.mxu0 %v994_v5 }
 0x3f5   :  { %1504 = vmatprep.mubr.msk.f32.mxu1 %vm555_vm2, %v642_v3 }
 0x3f6   :  { %1505 = vmatmul.mubr.msk.f32.vlgmr.msra.gmra.mxu1 %vm555_vm2, %v643_v2 }
 0x3f7   :  { %1513 = vmatpush3.msra.mxu1 %v992_v62 }
 0x3f8   :  { %1522 = vmatprep.subr.mxu1 %v995_v6 }
 0x458   :  { %v1485_v7 = vpop.f32.mrf.mxu1 }
 0x45a   :  { %v722_v8 = vpop.f32.mrf.mxu1 }
 0x45b   :  { %1514 = vmatprep.mubr.msk.f32.mxu1 %vm192_vm1, %v722_v8 }
 0x45c   :  { %1515 = vmatmul.mubr.msk.f32.vlgmr.msra.gmra.mxu1 %vm192_vm1, %v1485_v7 }
 0x45d   :  { %1523 = vmatpush3.msra.mxu1 %v995_v6 }
 0x4ad   :  { %v1492_v9 = vpop.f32.mrf.mxu1 }
 0x4af   :  { %v809_v10 = vpop.f32.mrf.mxu1 }
 0x4b0   :  { %1509 = vmatprep.mubr.msk.f32.mxu0 %vm192_vm1, %v809_v10 }
 0x4b1   :  { %1510 = vmatmul.mubr.msk.f32.vlgmr.msra.gmra.mxu0 %vm192_vm1, %v1492_v9 }
 0x4b2   :  { %v1499_v11 = vpop.f32.mrf.mxu0  ;;  %1518 = vmatpush3.msra.mxu0 %v994_v5 }
 0x4b4   :  { %v896_v12 = vpop.f32.mrf.mxu0 }
 0x4b5   :  { %1519 = vmatprep.mubr.msk.f32.mxu0 %vm192_vm1, %v896_v12 }
 0x4b6   :  { %v1506_v13 = vpop.f32.mrf.mxu1  ;;  %1520 = vmatmul.mubr.msk.f32.vlgmr.msra.gmra.mxu0 %vm192_vm1, %v1499_v11 }
 0x4b8   :  { %v983_v15 = vpop.f32.mrf.mxu1 }
 0x4b9   :  { %1524 = vmatprep.mubr.msk.f32.mxu1 %vm192_vm1, %v983_v15 }
 0x4ba   :  { %1525 = vmatmul.mubr.msk.f32.vlgmr.msra.gmra.mxu1 %vm192_vm1, %v1506_v13 }
 0x51c   :  { %v1516_v19 = vpop.f32.mrf.mxu1 }
 0x51e   :  { %v1149_v22 = vpop.f32.mrf.mxu1 }
 0x571   :  { %v1511_v17 = vpop.f32.mrf.mxu0 }
 0x572   :  { %v1155_v21 = vadd.f32 %v1516_v19, %v1511_v17 }
 0x573   :  { %v1068_v18 = vpop.f32.mrf.mxu0 }
 0x574   :  { %v1150_v24 = vadd.f32 %v1149_v22, %v1068_v18 }
 0x576   :  { %v1521_v20 = vpop.f32.mrf.mxu0 }
 0x577   :  { %v1240_v25 = vadd.f32 %v1521_v20, %v1155_v21 }
 0x578   :  { %v1230_v23 = vpop.f32.mrf.mxu0 }
 0x579   :  { %v1239_v28 = vadd.f32 %v1230_v23, %v1150_v24 }
 0x57a   :  { %v1526_v26 = vpop.f32.mrf.mxu1 }
 0x57b   :  { %v1323_v29 = vadd.f32 %v1526_v26, %v1240_v25 }
 0x57c   :  { %v1313_v30 = vpop.f32.mrf.mxu1 }
 0x57d   :  { %v1332_v31 = vadd.f32 %v1389_v27, %v1323_v29  ;;  %v1322_v32 = vadd.f32 %v1313_v30, %v1239_v28 }
 0x57f   :  { %1334 = vst.msk [vmem:[#allocation10 + $0x8] sm:$0xff] %vm92_vm0, %v1332_v31  ;;  %v1331_v33 = vadd.f32 %v1389_v27, %v1322_v32 }
 0x581   :  { %1333 = vst.msk [vmem:[#allocation10] sm:$0xff] %vm92_vm0, %v1331_v33 }
 0x582   :  { %1662 = shalt.err (!%p1659_p10)
}
 0x583   :  { %1346 = dma.vmem_to_hbm [thread:$0]  %s1341_s24, 256, %s1890_s6, [#allocation4], %s1681_s26, %s1681_s26, %s1682_s27  }
 0x584   :  { %1677 = dma.done.wait [#allocation4], 256  }
 0x585   :  { %1678 = vsyncadd [#allocation4], 4294967040 }
 0x586   :  { %1350 = vsyncpa [#allocation3], 1 }
 0x587   :  { %1351 = vsyncpa [#allocation6], 1 }
 0x588   :  { %1352 = vsyncpa [#allocation9], 1 }
 0x589   :  { %1353 = vsyncpa [#allocation4], 1 }

</bundles_post_ra>
